<compile_context>
chip_gen: v6e
topology: v6e:2x2x1
jax: 0.10.0
libtpu: 0.0.40
codegen_flags: <defaults>
</compile_context>

<pallas_src>
import jax
import jax.numpy as jnp
from jax.experimental import pallas as pl
from jax.experimental.pallas import tpu as pltpu

# ---- synthetic net configuration -------------------------------------------
C_IN = 4       # input channels (e.g. RGB-D)
C_FEAT = 32    # backbone feature channels
NUM_HEADS = 4  # quality, cos, sin, width
_OUTPUT_IDX = {"quality": 0, "cos": 1, "sin": 2, "width": 3}


# ---- Pallas kernel: fused relu(W1^T x + b1) -> selected-head (W2^T . + b2) --
def _grconv_head_kernel(x_ref, w1t_ref, b1_ref, w2t_ref, b2_ref, o_ref):
    # x_ref:   (1, C_IN, tm)   one spatial tile, channel-major (lane = spatial)
    # w1t_ref: (C_FEAT, C_IN)  backbone 1x1 conv weight, transposed
    # b1_ref:  (C_FEAT, 1)
    # w2t_ref: (1, C_FEAT)     single selected head's 1x1 conv weight (row)
    # b2_ref:  (1, 1)
    # o_ref:   (1, 1, tm)      selected head output for this tile (lane-dense)
    x = x_ref[0]                                               # (C_IN, tm)
    h = jnp.dot(w1t_ref[...], x, preferred_element_type=jnp.float32)  # (C_FEAT, tm)
    h = jnp.maximum(h + b1_ref[...], 0.0)
    y = jnp.dot(w2t_ref[...], h, preferred_element_type=jnp.float32)  # (1, tm)
    o_ref[0] = y + b2_ref[...]


def _run_net(x_ncs, w1t, b1_col, w2t_sel, b2_sel, *, tm):
    """x_ncs: (N, C_IN, S) float32 with S divisible by tm.  Returns (N, 1, S)."""
    N, C, S = x_ncs.shape
    grid = (N, S // tm)
    return pl.pallas_call(
        _grconv_head_kernel,
        out_shape=jax.ShapeDtypeStruct((N, 1, S), jnp.float32),
        grid_spec=pltpu.PrefetchScalarGridSpec(
            num_scalar_prefetch=0,
            grid=grid,
            in_specs=[
                pl.BlockSpec((1, C_IN, tm), lambda n, j: (n, 0, j)),
                pl.BlockSpec((C_FEAT, C_IN), lambda n, j: (0, 0)),
                pl.BlockSpec((C_FEAT, 1), lambda n, j: (0, 0)),
                pl.BlockSpec((1, C_FEAT), lambda n, j: (0, 0)),
                pl.BlockSpec((1, 1), lambda n, j: (0, 0)),
            ],
            out_specs=pl.BlockSpec((1, 1, tm), lambda n, j: (n, 0, j)),
        ),
        compiler_params=pltpu.CompilerParams(
            dimension_semantics=("parallel", "parallel"),
        ),
    )(x_ncs, w1t, b1_col, w2t_sel, b2_sel)


# ---- module-equivalent wrapper ----------------------------------------------
def init_params(key):
    """Deterministic synthetic parameters for the wrapped net."""
    k1, k2, k3, k4 = jax.random.split(key, 4)
    w1 = jax.random.normal(k1, (C_IN, C_FEAT), jnp.float32) * 0.1
    b1 = jax.random.normal(k2, (1, C_FEAT), jnp.float32) * 0.01
    w2 = jax.random.normal(k3, (C_FEAT, NUM_HEADS), jnp.float32) * 0.1
    b2 = jax.random.normal(k4, (1, NUM_HEADS), jnp.float32) * 0.01
    return w1, b1, w2, b2


def _round_up(x, m):
    return (x + m - 1) // m * m


def extract_output_model(x_nchw, params, output="width", *, max_tm=2048):
    """Equivalent of ExtractOutputModel(model, output)(x).

    x_nchw: (N, C_IN, H, W) float32, NCHW (PyTorch convention).
    Returns the selected head map with shape (N, 1, H, W).
    """
    idx = _OUTPUT_IDX[output]
    w1, b1, w2, b2 = params
    N, C, H, W = x_nchw.shape
    assert C == C_IN

    # Static head selection *before* the kernel: write only one map.
    w1t = jnp.transpose(w1)                       # (C_FEAT, C_IN), tiny
    b1_col = jnp.reshape(b1, (C_FEAT, 1))
    w2t_sel = jnp.transpose(w2[:, idx:idx + 1])   # (1, C_FEAT)
    b2_sel = b2[:, idx:idx + 1]                   # (1, 1)

    # NCHW -> (N, C_IN, H*W) is a pure reshape (no transpose, no data movement).
    S = H * W
    x_ncs = x_nchw.reshape(N, C_IN, S)

    # Lane-dense spatial tile: multiple of 128, capped so tiny inputs still work
    # and padding overhead stays bounded.
    tm = min(max_tm, _round_up(S, 128))
    S_pad = _round_up(S, tm)
    if S_pad != S:
        x_ncs = jnp.pad(x_ncs, ((0, 0), (0, 0), (0, S_pad - S)))

    y = _run_net(x_ncs, w1t, b1_col, w2t_sel, b2_sel, tm=tm)   # (N, 1, S_pad)
    return y[:, :, :S].reshape(N, 1, H, W)


# ---- reference (pure JAX) for sanity ----------------------------------------
def _reference(x_nchw, params, output="width"):
    idx = _OUTPUT_IDX[output]
    w1, b1, w2, b2 = params
    N, C, H, W = x_nchw.shape
    x_rows = jnp.transpose(x_nchw, (0, 2, 3, 1)).reshape(N * H * W, C)
    h = jnp.maximum(x_rows @ w1 + b1, 0.0)
    y = h @ w2 + b2
    return y[:, idx].reshape(N, H, W)[:, None, :, :]


if __name__ == "__main__":
    key = jax.random.PRNGKey(0)
    pkey, xkey = jax.random.split(key)
    params = init_params(pkey)

    # Small NCHW input: batch=2, channels=4, spatial=16x16.
    x = jax.random.normal(xkey, (2, C_IN, 16, 16), jnp.float32)

    out = extract_output_model(x, params, output="width")
    out = jax.block_until_ready(out)

    ref = _reference(x, params, output="width")
    assert out.shape == (2, 1, 16, 16), out.shape
    assert jnp.allclose(out, ref, atol=1e-5, rtol=1e-5), "mismatch vs reference"

    print("KERNEL_OK")
</pallas_src>

<mosaic_0001>
module attributes {stable_mosaic.version = 11 : i64} {
  func.func @_grconv_head_kernel(%arg0: i32, %arg1: i32, %arg2: memref<1x4x256xf32, #tpu.memory_space<vmem>>, %arg3: memref<32x4xf32, #tpu.memory_space<vmem>>, %arg4: memref<32x1xf32, #tpu.memory_space<vmem>>, %arg5: memref<1x32xf32, #tpu.memory_space<vmem>>, %arg6: memref<1x1xf32, #tpu.memory_space<vmem>>, %arg7: memref<1x1x256xf32, #tpu.memory_space<vmem>>) attributes {dimension_semantics = [#tpu.dimension_semantics<parallel>, #tpu.dimension_semantics<parallel>], iteration_bounds = array<i64: 2, 1>, scalar_prefetch = 0 : i64, scratch_operands = 0 : i64, tpu.core_type = #tpu.core_type<tc>, window_params = [{transform_indices = @transform_0, window_bounds = array<i64: 1, 4, 256>}, {pipeline_mode = #tpu.pipeline_mode<synchronous>, transform_indices = @transform_1, window_bounds = array<i64: 32, 4>}, {pipeline_mode = #tpu.pipeline_mode<synchronous>, transform_indices = @transform_2, window_bounds = array<i64: 32, 1>}, {pipeline_mode = #tpu.pipeline_mode<synchronous>, transform_indices = @transform_3, window_bounds = array<i64: 1, 32>}, {pipeline_mode = #tpu.pipeline_mode<synchronous>, transform_indices = @transform_4, window_bounds = array<i64: 1, 1>}, {transform_indices = @transform_5, window_bounds = array<i64: 1, 1, 256>}]} {
    %c0 = arith.constant 0 : index
    %c0_0 = arith.constant 0 : index
    %c0_1 = arith.constant 0 : index
    %0 = vector.load %arg2[%c0, %c0_0, %c0_1] : memref<1x4x256xf32, #tpu.memory_space<vmem>>, vector<1x4x256xf32>
    %1 = vector.shape_cast %0 : vector<1x4x256xf32> to vector<4x256xf32>
    %c0_2 = arith.constant 0 : index
    %c0_3 = arith.constant 0 : index
    %2 = vector.load %arg3[%c0_2, %c0_3] : memref<32x4xf32, #tpu.memory_space<vmem>>, vector<32x4xf32>
    %cst = arith.constant dense<0.000000e+00> : vector<32x256xf32>
    %3 = tpu.matmul %2, %1, %cst {dimension_numbers = #tpu.dot_dimension_numbers<[1], [0], [0], [1], [0, 0, 1, 1], [], []>} : vector<32x4xf32>, vector<4x256xf32>, vector<32x256xf32> -> vector<32x256xf32>
    %c0_4 = arith.constant 0 : index
    %c0_5 = arith.constant 0 : index
    %4 = vector.load %arg4[%c0_4, %c0_5] : memref<32x1xf32, #tpu.memory_space<vmem>>, vector<32x1xf32>
    %5 = vector.broadcast %4 : vector<32x1xf32> to vector<32x256xf32>
    %6 = arith.addf %3, %5 : vector<32x256xf32>
    %cst_6 = arith.constant 0.000000e+00 : f32
    %7 = vector.broadcast %cst_6 : f32 to vector<32x256xf32>
    %8 = arith.maximumf %6, %7 : vector<32x256xf32>
    %c0_7 = arith.constant 0 : index
    %c0_8 = arith.constant 0 : index
    %9 = vector.load %arg5[%c0_7, %c0_8] : memref<1x32xf32, #tpu.memory_space<vmem>>, vector<1x32xf32>
    %cst_9 = arith.constant dense<0.000000e+00> : vector<1x256xf32>
    %10 = tpu.matmul %9, %8, %cst_9 {dimension_numbers = #tpu.dot_dimension_numbers<[1], [0], [0], [1], [0, 0, 1, 1], [], []>} : vector<1x32xf32>, vector<32x256xf32>, vector<1x256xf32> -> vector<1x256xf32>
    %c0_10 = arith.constant 0 : index
    %c0_11 = arith.constant 0 : index
    %11 = vector.load %arg6[%c0_10, %c0_11] : memref<1x1xf32, #tpu.memory_space<vmem>>, vector<1x1xf32>
    %12 = vector.broadcast %11 : vector<1x1xf32> to vector<1x256xf32>
    %13 = arith.addf %10, %12 : vector<1x256xf32>
    %c0_12 = arith.constant 0 : index
    %c0_13 = arith.constant 0 : index
    %c0_14 = arith.constant 0 : index
    %14 = vector.load %arg7[%c0_12, %c0_13, %c0_14] : memref<1x1x256xf32, #tpu.memory_space<vmem>>, vector<1x1x256xf32>
    %15 = vector.shape_cast %14 : vector<1x1x256xf32> to vector<1x256xf32>
    %16 = vector.shape_cast %13 : vector<1x256xf32> to vector<1x1x256xf32>
    tpu.vector_store %arg7[%c0_12, %c0_13, %c0_14], %16 {strides = array<i32>} : memref<1x1x256xf32, #tpu.memory_space<vmem>>, vector<1x1x256xf32>,
    return
  }
  func.func @transform_0(%arg0: i32, %arg1: i32) -> (i32, i32, i32) {
    %c0_i32 = arith.constant 0 : i32
    %c0_i32_0 = arith.constant 0 : i32
    return %arg0, %c0_i32, %arg1 : i32, i32, i32
  }
  func.func @transform_1(%arg0: i32, %arg1: i32) -> (i32, i32) {
    %c0_i32 = arith.constant 0 : i32
    %c0_i32_0 = arith.constant 0 : i32
    %c0_i32_1 = arith.constant 0 : i32
    return %c0_i32, %c0_i32_0 : i32, i32
  }
  func.func @transform_2(%arg0: i32, %arg1: i32) -> (i32, i32) {
    %c0_i32 = arith.constant 0 : i32
    %c0_i32_0 = arith.constant 0 : i32
    %c0_i32_1 = arith.constant 0 : i32
    return %c0_i32, %c0_i32_0 : i32, i32
  }
  func.func @transform_3(%arg0: i32, %arg1: i32) -> (i32, i32) {
    %c0_i32 = arith.constant 0 : i32
    %c0_i32_0 = arith.constant 0 : i32
    %c0_i32_1 = arith.constant 0 : i32
    return %c0_i32, %c0_i32_0 : i32, i32
  }
  func.func @transform_4(%arg0: i32, %arg1: i32) -> (i32, i32) {
    %c0_i32 = arith.constant 0 : i32
    %c0_i32_0 = arith.constant 0 : i32
    %c0_i32_1 = arith.constant 0 : i32
    return %c0_i32, %c0_i32_0 : i32, i32
  }
  func.func @transform_5(%arg0: i32, %arg1: i32) -> (i32, i32, i32) {
    %c0_i32 = arith.constant 0 : i32
    %c0_i32_0 = arith.constant 0 : i32
    return %arg0, %c0_i32, %arg1 : i32, i32, i32
  }
}

</mosaic_0001>

<bundles_post_ra>
// kernel: tpu_custom_call.1
= control target key start
LH: loop header
LB: loop body
LE: loop exit
PB: predicated region body
PF: predicated region fallthrough
CT: control target
= control target key end

     0   :  { %s928_s0 = inlined_call_operand.vmem [shape: f32[2,4,256], index: 0, kind: input, shape index: {}]   ;;  %s929_s1 = inlined_call_operand.vmem [shape: f32[32,4], index: 1, kind: input, shape index: {}]   ;;  %s930_s2 = inlined_call_operand.vmem [shape: f32[32,1], index: 2, kind: input, shape index: {}]   ;;  %s931_s3 = inlined_call_operand.vmem [shape: f32[1,32], index: 3, kind: input, shape index: {}]   ;;  %s932_s4 = inlined_call_operand.<no memory space> [shape: f32[1,1], index: 4, kind: input, shape index: {}]   ;;  %s933_s5 = inlined_call_operand.hbm [shape: f32[2,1,256], index: 5, kind: output, shape index: {}]  }
   0x1   :  { %v10_v0 = vstv %s932_s4 }
   0x2   :  { %11 = vst [vmem:[#allocation2] sm:$0x1] %v10_v0 }
   0x3   :  { %12 = vsyncpa [#allocation4], 0 }
   0x4   :  { %14 = vsyncpa [#allocation4 + $0x1], 0  ;;  %s802_s20 = smov 0   ;;  %s804_s21 = smov 0  }
   0x5   :  { %s806_s22 = smov 0   ;;  %s808_s23 = smov 0  }
   0x6   :  { %s810_s24 = smov 0   ;;  %s812_s25 = smov 0  }
   0x7 LB: > { %s604_s4 = sadd.s32 4294967295, %s763_s25   ;;  %s605_s26 = sadd.s32 4294967294, %s763_s25   ;;  %s763_s25 = sphi %s812_s25, %s20_s25   ;;  %s759_s24 = sphi %s810_s24, %s940_s24   ;;  %s755_s23 = sphi %s808_s23, %s939_s23   ;;  %s751_s22 = sphi %s806_s22, %s938_s22   ;;  %s747_s21 = sphi %s804_s21, %s937_s21   ;;  %s743_s20 = sphi %s802_s20, %s936_s20  }
   0x8   : > { %s32_s27 = sadd.s32 1, %s759_s24  ;;  %s153_s28 = sadd.s32 1, %s751_s22 }
   0x9   : > { %p34_p0 = scmp.ge.s32.totalorder %s32_s27, 2  ;;  %p163_p1 = scmp.ne.s32.totalorder %s751_s22, %s747_s21 }
   0xa   : > { %p164_p2 = scmp.eq.s32.totalorder %s604_s4, 1  ;;  %p169_p3 = scmp.ne.s32.totalorder %s747_s21, %s743_s20 }
   0xb   : > { %s942_s27 = smov (%p34_p0, %s32_s27), 0  ;;  %p170_p5 = scmp.eq.s32.totalorder %s605_s26, 1 }
   0xc   : > { %p842_p4 = por %p164_p2, %p163_p1  ;;  %s148_s30 = ssub.s32 %s759_s24, %s942_s27 }
   0xd   : > { %p608_p6 = scmp.ge.s32.totalorder %s763_s25, 1  ;;  %p151_p7 = scmp.eq.s32.totalorder %s148_s30, 0 }
   0xe   : > { %p849_p8 = por %p170_p5, %p169_p3  ;;  %p213_p9 = scmp.lt.s32.totalorder %s763_s25, 3 }
   0xf   : > { %s855_s7 = scalar_select %p151_p7, %s751_s22, %s153_s28  }
  0x10   : > { %p214_p10 = pnand %p608_p6, %p213_p9 }
  0x11   : > { %p246_p11 = scmp.lt.s32.totalorder (!%p214_p10), %s755_s23, 1  ;;  %s242_s15 = sand.u32 (!%p214_p10), 1, %s747_s21  }
  0x12   : > { %217 = sbr.rel (%p214_p10) target bundleno = 468 (0x1d4), region = 40  ;;  %s609_s16 = sshll.u32 (!%p214_p10), %s242_s15, 1 }
  0x13   : > { %s625_s17 = sshll.u32 (!%p214_p10), %s755_s23, 5  ;;  %s244_s18 = scalar_lea.vmem (!%p214_p10), [#allocation3], %s609_s16 }
  0x14   : > { %s528_s19 = sshll.u32 (!%p214_p10), %s244_s18, 4  ;;  %s526_s28 = scalar_lea.hbm (!%p214_p10), %s933_s5, %s625_s17  ;;  %s529_s19 = int_to_ptr.vmem [resolvable:$true] %s528_s19 }
  0x15   : > { %s512_s30 = scalar_lea.sflag (!%p214_p10), [#allocation4], %s242_s15  ;;  %s687_s8 = scalar_lea.vmem (!%p214_p10), %s529_s19, 32 }
  0x16   : > { %p688_p12 = scmp.ne.s32.totalorder (!%p214_p10), %s529_s19, %s687_s8  ;;  %s768_s9 = smov (!%p214_p10), [#allocation3]  }
  0x17   : > { %v765_v1 = vmov 0.0   ;;  %v262_v2 = vld [vmem:[%s930_s2 + $0x8] sm:$0xff]  ;;  %s247_s10 = scalar_select %p246_p11, %s755_s23, 1  ;;  %v766_v3 = vmov 0   ;;  %v264_v4 = vld [vmem:[%s930_s2 + $0x18] sm:$0xff]  ;;  %v261_v5 = vld [vmem:[%s930_s2] sm:$0xff]  ;;  %v409_v43 = vlaneseq }
  0x18   : > { %369 = vmatprep.mubr.f32.mxu0 %v765_v1  ;;  %481 = vmatprep.mubr.f32.mxu1 %v765_v1  ;;  %v263_v6 = vld [vmem:[%s930_s2 + $0x10] sm:$0xff]  ;;  %vm300_vm0 = vcmask 1043456   ;;  %v257_v9 = vld [vmem:[%s929_s1] sm:$0xff]  ;;  %vm287_vm1 = vcmask 31744   ;;  %v258_v11 = vld [vmem:[%s929_s1 + $0x8] sm:$0xff]  ;;  %vm413_vm2 = vcmask 261120   ;;  %p689_p13 = pnand %p688_p12, %p842_p4 }
  0x19   : > { %685 = vset.pattern.permute.xlu1 %v766_v3  ;;  %684 = vset.pattern.permute.xlu0 %v766_v3  ;;  %s624_s13 = sshll.u32 %s247_s10, 3  ;;  %v403_v10 = vld [vmem:[#allocation2] sm:$0x1]  ;;  %v259_v12 = vld [vmem:[%s929_s1 + $0x10] sm:$0xff]  ;;  %v260_v13 = vld [vmem:[%s929_s1 + $0x18] sm:$0xff]  ;;  %v410_v44 = vshrl.u32 %v409_v43, 7 }
  0x1a   : > { %272 = vperm.xlu1 %685, %v262_v2   ;;  %282 = vperm.xlu0 %684, %v264_v4   ;;  %s253_s4 = scalar_lea.vmem %s928_s0, %s624_s13  ;;  %v402_v42 = vld [vmem:[%s931_s3] sm:$0x1]  ;;  %v767_v45 = vmov 1966171168   ;;  %vm508_vm3 = vcmp.lt.s32.totalorder %v409_v43, 256  ;;  %p690_p0 = pneg %p689_p13 }
  0x1b   : > { %v256_v7 = vld [vmem:[%s253_s4] sm:$0xff]  ;;  %v492_v46 = vunpack.c.l.s4 %v767_v45  ;;  %v411_v47 = vsub.s32 0, %v410_v44  ;;  %s691_s10 = sshll.u32 %s768_s9, 4  ;;  %s692_s10 = int_to_ptr.vmem [resolvable:$false] %s691_s10 }
  0x1c   : > { %v286_v8 = vcombine.high %v256_v7, %v256_v7  ;;  %s693_s23 = scalar_lea.vmem %s692_s10, 64  ;;  %p694_p1 = scmp.lt.s32.totalorder %s529_s19, %s692_s10 }
  0x1d   : > { %v493_v49 = vunpack.c.0.s8 %v492_v46  ;;  %p695_p2 = scmp.lt.s32.totalorder %s693_s23, %s687_s8 }
  0x1e   : > { %267 = vperm.xlu1 %685, %v261_v5   ;;  %277 = vperm.xlu0 %684, %v263_v6  }
  0x1f   : > { %612 = vmatprep.subr.msk.mxu0 %vm300_vm0, %v286_v8  ;;  %v496_v55 = vsub.s32 %v493_v49, %v410_v44  ;;  %p696_p3 = por %p695_p2, %p694_p1 }
  0x20   : > { %613 = vmatpush1.msk.msra.mxu0 %vm300_vm0, %v256_v7 }
  0x21   : > { %614 = vmatmul.mubr.msk.f32.vlgmr.msra.gmra.mxu0 %vm287_vm1, %v257_v9  ;;  %p697_p5 = pnand %p696_p3, %p690_p0 }
  0x22   : > { %406 = vperm.xlu0 %684, %v403_v10   ;;  %375 = vmatprep.mubr.f32.mxu0 %v765_v1 }
  0x25   : > { %615 = vmatmul.mubr.msk.f32.gmra.mxu0 %vm287_vm1, %v258_v11 }
  0x26   : > { %381 = vmatprep.mubr.f32.mxu0 %v765_v1 }
  0x29   : > { %616 = vmatmul.mubr.msk.f32.gmra.mxu0 %vm287_vm1, %v259_v12 }
  0x2a   : > { %387 = vmatprep.mubr.f32.mxu0 %v765_v1 }
  0x2d   : > { %617 = vmatmul.mubr.msk.f32.gmra.mxu0 %vm287_vm1, %v260_v13 }
  0x95   : > { %v283_v18 = vpop.permute.xlu0 %282  ;;  %v273_v21 = vpop.permute.xlu1 %272 }
  0x99   : > { %v278_v23 = vpop.permute.xlu0 %277  ;;  %v268_v29 = vpop.permute.xlu1 %267 }
  0x9d   : > { %v407_v48 = vpop.permute.xlu0 %406 }
  0x9e   : > { %v412_v51 = vrot.slane %v407_v48, %v411_v47 }
  0xe1   : > { %v371_v14 = vpop.f32.mrf.mxu0 }
  0xe2   : > { %v372_v36 = vadd.f32 %v371_v14, %v268_v29 }
  0xe3   : > { %v373_v15 = vpop.f32.mrf.mxu0 }
  0xe4   : > { %v374_v34 = vadd.f32 %v373_v15, %v268_v29  ;;  %v394_v41 = vmax.f32 %v372_v36, 0.0 }
  0xe5   : > { %v377_v16 = vpop.f32.mrf.mxu0 }
  0xe6   : > { %v378_v32 = vadd.f32 %v377_v16, %v273_v21  ;;  %v395_v40 = vmax.f32 %v374_v34, 0.0 }
  0xe7   : > { %v379_v17 = vpop.f32.mrf.mxu0 }
  0xe8   : > { %v380_v30 = vadd.f32 %v379_v17, %v273_v21  ;;  %v396_v39 = vmax.f32 %v378_v32, 0.0 }
  0xe9   : > { %v383_v19 = vpop.f32.mrf.mxu0 }
  0xea   : > { %v384_v28 = vadd.f32 %v383_v19, %v278_v23  ;;  %v397_v38 = vmax.f32 %v380_v30, 0.0 }
  0xeb   : > { %v385_v20 = vpop.f32.mrf.mxu0 }
  0xec   : > { %v386_v26 = vadd.f32 %v385_v20, %v278_v23  ;;  %v398_v37 = vmax.f32 %v384_v28, 0.0 }
  0xed   : > { %v389_v22 = vpop.f32.mrf.mxu0 }
  0xee   : > { %v390_v24 = vadd.f32 %v389_v22, %v283_v18  ;;  %v399_v35 = vmax.f32 %v386_v26, 0.0 }
  0xef   : > { %v391_v25 = vpop.f32.mrf.mxu0 }
  0xf0   : > { %v392_v27 = vadd.f32 %v391_v25, %v283_v18  ;;  %v400_v33 = vmax.f32 %v390_v24, 0.0 }
  0xf2   : > { %v401_v31 = vmax.f32 %v392_v27, 0.0 }
  0xf4   : > { %441 = vmatprep.subr.mxu1 %v401_v31 }
  0xf5   : > { %442 = vmatpush1.msra.mxu1 %v400_v33 }
  0xf6   : > { %443 = vmatprep.subr.mxu1 %v399_v35 }
  0xf7   : > { %444 = vmatpush1.msra.mxu1 %v398_v37 }
  0xf8   : > { %445 = vmatprep.subr.mxu1 %v397_v38 }
  0xf9   : > { %446 = vmatpush1.msra.mxu1 %v396_v39 }
  0xfa   : > { %447 = vmatprep.subr.mxu1 %v395_v40 }
  0xfb   : > { %448 = vmatpush1.msra.mxu1 %v394_v41 }
  0xfc   : > { %618 = vmatmul.mubr.msk.f32.vlgmr.msra.gmra.mxu1 %vm413_vm2, %v402_v42 }
 0x1bc   : > { %v483_v50 = vpop.f32.mrf.mxu1 }
 0x1bd   : > { %v484_v53 = vadd.f32 %v483_v50, %v412_v51 }
 0x1be   : > { %v485_v52 = vpop.f32.mrf.mxu1 }
 0x1bf   : > { %v486_v54 = vadd.f32 %v485_v52, %v412_v51 }
 0x1c1   : > { %v490_v56 = vcombine.low %v484_v53, %v486_v54 }
 0x1c3   : > { %v497_v57 = vrot.slane %v490_v56, %v496_v55 }
 0x1c5   : > { %v504_v58 = vrot.slane %v497_v57, %v496_v55 }
 0x1c7   : > { %510 = vst.msk [vmem:[%s244_s18] sm:$0x3] %vm508_vm3, %v504_v58 }
 0x1c8   : > { %700 = shalt.err (!%p697_p5)
}
 0x1c9   : > { %s701_s11 = scalar_lea.hbm %s526_s28, 32  ;;  %s705_s14 = scalar_lea.hbm %s933_s5, 64 }
 0x1ca   : > { %p702_p6 = scmp.ne.s32.totalorder %s526_s28, %s701_s11  ;;  %p706_p10 = scmp.lt.s32.totalorder %s526_s28, %s933_s5 }
 0x1cb   : > { %p707_p11 = scmp.lt.s32.totalorder %s705_s14, %s701_s11 }
 0x1cc   : > { %p703_p7 = pnand %p702_p6, %p842_p4 }
 0x1cd   : > { %p708_p12 = por %p707_p11, %p706_p10 }
 0x1ce   : > { %p704_p9 = pneg %p703_p7 }
 0x1d0   : > { %p709_p13 = pnand %p708_p12, %p704_p9 }
 0x1d2   : > { %712 = shalt.err (!%p709_p13)
}
 0x1d3   : > { %626 = dma.vmem_to_hbm [thread:$0]  (%p842_p4), %s529_s19, 32, %s526_s28, %s512_s30  }
 0x1d4 PF: > { %p632_p0 = scmp.ge.s32.totalorder %s763_s25, 2  ;;  %s540_s17 = sand.u32 1, %s743_s20  }
 0x1d5   : > { %s541_s18 = scalar_lea.sflag [#allocation4], %s540_s17 }
 0x1d6   : > { %p629_p1 = pnand %p632_p0, %p849_p8 }
 0x1d8   : > { %p630_p2 = pneg %p629_p1 }
 0x1da   : > { %738 = dma.done.wait (%p630_p2), %s541_s18, 32  }
 0x1db   : > { %740 = vsyncadd (%p630_p2), %s541_s18, 4294967264  ;;  %s20_s25 = sadd.s32 1, %s763_s25   ;;  %s936_s20 = smov %s747_s21 }
 0x1dc   : > { %p17_p3 = scmp.ge.s32.totalorder %s20_s25, 4   ;;  %s937_s21 = smov %s751_s22 }
 0x1dd   : > { %s938_s22 = smov %s855_s7  ;;  %s939_s23 = smov %s759_s24 }
 0x1de   : > { %s940_s24 = smov %s942_s27  ;;  %19 = sbr.rel (!%p17_p3) target bundleno = 7 (0x7), region = 75 }
 0x1e3   :  { %546 = vsyncpa [#allocation4], 1 }
 0x1e4   :  { %548 = vsyncpa [#allocation4 + $0x1], 1 }

</bundles_post_ra>
